<compile_context>
chip_gen: v7x
topology: tpu7x:2x2x1
jax: 0.10.0
libtpu: 0.0.40
codegen_flags: <defaults>
</compile_context>

<pallas_src>
import functools

import jax
import jax.numpy as jnp
from jax import lax
from jax.experimental import pallas as pl
from jax.experimental.pallas import tpu as pltpu


_SQRT_HALF = 0.7071067811865476  # 1/sqrt(2)
_LANE = 128


def _round_up(n, m):
    return ((n + m - 1) // m) * m


def _mlp_kernel(x_ref, w1_ref, b1_ref, w2_ref, b2_ref, o_ref, acc_ref, *,
                num_chunks, chunk, compute_dtype):
    """Fused fc1 -> exact GELU -> fc2, chunked over the hidden dimension."""
    # Cast activations to the MXU compute dtype in-kernel (VPU work hidden under
    # MXU slack) instead of a separate wrapper-side HBM pad/cast pass.
    x = x_ref[...].astype(compute_dtype)

    # Fully static loop -> fully unrolled; the scheduler can co-issue GELU of one
    # chunk with the matmuls of neighbouring chunks.
    for k in range(num_chunks):
        k0 = k * chunk
        # fc1 chunk: (rt, Cin) @ (Cin, chunk), f32 accumulation on the MXU.
        h = jnp.dot(x, w1_ref[:, pl.ds(k0, chunk)],
                    preferred_element_type=jnp.float32)
        h = h + b1_ref[:, pl.ds(k0, chunk)]
        # Exact GELU (erf formulation), matching torch.nn.GELU's default.
        h = 0.5 * h * (1.0 + lax.erf(h * _SQRT_HALF))
        # fc2 chunk: (rt, chunk) @ (chunk, Cout_p), accumulated in f32 scratch.
        contrib = jnp.dot(h.astype(compute_dtype),
                          w2_ref[pl.ds(k0, chunk), :],
                          preferred_element_type=jnp.float32)
        if k == 0:
            acc_ref[...] = contrib
        else:
            acc_ref[...] += contrib

    o_ref[...] = (acc_ref[...] + b2_ref[...]).astype(o_ref.dtype)


def prepare_mlp_params(w1, b1, w2, b2, *, compute_dtype=jnp.bfloat16):
    """One-time parameter prep (call once, outside the per-step path).

    Casts weights to the MXU compute dtype and zero-pads hidden / output feature
    dims to lane (128) multiples so loads and, in particular, output stores are
    lane-dense. Padding is exact: b1 pads with 0, GELU(0) == 0, and zero rows /
    columns of W2 contribute nothing.
    """
    cin, hid = w1.shape
    hid2, cout = w2.shape
    assert hid2 == hid and b1.shape == (hid,) and b2.shape == (cout,)
    hid_p = _round_up(hid, _LANE)
    cout_p = _round_up(cout, _LANE)
    w1p = jnp.zeros((cin, hid_p), compute_dtype).at[:, :hid].set(
        w1.astype(compute_dtype))
    b1p = jnp.zeros((1, hid_p), jnp.float32).at[0, :hid].set(
        b1.astype(jnp.float32))
    w2p = jnp.zeros((hid_p, cout_p), compute_dtype).at[:hid, :cout].set(
        w2.astype(compute_dtype))
    b2p = jnp.zeros((1, cout_p), jnp.float32).at[0, :cout].set(
        b2.astype(jnp.float32))
    return (w1p, b1p, w2p, b2p), cout


def _vmem_capacity_bytes():
    try:
        return int(pltpu.get_tpu_info().vmem_capacity_bytes)
    except Exception:
        return 64 * 1024 * 1024  # v7x per-TC VMEM: most conservative fallback


def mlp_pallas(x, params, *, out_features=None, row_tile=512,
               compute_dtype=jnp.bfloat16, out_dtype=None):
    """x: (..., Cin); params from prepare_mlp_params. Returns (..., Cout)."""
    w1p, b1p, w2p, b2p = params
    orig_shape = x.shape
    cin = orig_shape[-1]
    assert w1p.shape[0] == cin
    hid_p = w1p.shape[1]
    cout_p = w2p.shape[1]
    cout = cout_p if out_features is None else int(out_features)
    out_dtype = x.dtype if out_dtype is None else out_dtype

    x2d = x.reshape(-1, cin)
    rows = x2d.shape[0]

    # Hidden-dim chunk: largest of {512, 256, 128} dividing hid_p.
    if hid_p % 512 == 0:
        chunk = 512
    elif hid_p % 256 == 0:
        chunk = 256
    else:
        chunk = 128
    num_chunks = hid_p // chunk

    # Row tile: 256-aligned (MXU height on v6e/v7x) when rows allow, else 8-aligned.
    rt = min(int(row_tile), _round_up(rows, 8))
    if rows >= 256:
        rt = max(256, (rt // 256) * 256)
    else:
        rt = _round_up(rt, 8)
    num_tiles = pl.cdiv(rows, rt)
    # Megacore: ensure >= 2 row tiles when there is enough work for two TCs.
    if num_tiles == 1 and rows >= 2 * 256:
        rt = _round_up(pl.cdiv(rows, 2), 256)
        num_tiles = pl.cdiv(rows, rt)

    x_isz = jnp.dtype(x.dtype).itemsize
    o_isz = jnp.dtype(out_dtype).itemsize
    c_isz = jnp.dtype(compute_dtype).itemsize

    def vmem_needed(rt_):
        return (2 * rt_ * cin * x_isz              # x tiles (double buffered)
                + rt_ * cin * c_isz                # in-kernel cast of x
                + 2 * rt_ * cout_p * o_isz         # out tiles (double buffered)
                + cin * hid_p * c_isz              # W1 (single buffered)
                + hid_p * cout_p * c_isz           # W2 (single buffered)
                + (hid_p + cout_p) * 4             # biases (f32)
                + rt_ * cout_p * 4                 # f32 accumulator scratch
                + rt_ * chunk * (4 + c_isz))       # per-chunk h (f32 + bf16)

    vmem_cap = int(0.85 * _vmem_capacity_bytes())
    if vmem_needed(rt) > vmem_cap and rt > 256:
        rt = 256
        num_tiles = pl.cdiv(rows, rt)
    vmem_limit = int(min(max(vmem_needed(rt) * 5 // 4, 32 * 1024 * 1024),
                         vmem_cap))

    cost = pl.CostEstimate(
        flops=2 * rows * (cin * hid_p + hid_p * cout_p),
        transcendentals=rows * hid_p,  # erf
        bytes_accessed=(rows * cin * x_isz
                        + cin * hid_p * c_isz + hid_p * cout_p * c_isz
                        + (hid_p + cout_p) * 4
                        + rows * cout_p * o_isz),
    )

    kernel = functools.partial(_mlp_kernel, num_chunks=num_chunks, chunk=chunk,
                               compute_dtype=compute_dtype)

    out = pl.pallas_call(
        kernel,
        out_shape=jax.ShapeDtypeStruct((rows, cout_p), out_dtype),
        grid_spec=pltpu.PrefetchScalarGridSpec(
            num_scalar_prefetch=0,
            grid=(num_tiles,),
            in_specs=[
                # x: row-tiled, default double-buffered pipelining; the last
                # tile may be ragged (Pallas masks the boundary), so rows are
                # never padded in the wrapper.
                pl.BlockSpec((rt, cin), lambda i: (i, 0)),
                # Grid-invariant weights / biases: single-buffered in VMEM.
                pl.BlockSpec((cin, hid_p), lambda i: (0, 0),
                             pipeline_mode=pl.Buffered(1)),
                pl.BlockSpec((1, hid_p), lambda i: (0, 0),
                             pipeline_mode=pl.Buffered(1)),
                pl.BlockSpec((hid_p, cout_p), lambda i: (0, 0),
                             pipeline_mode=pl.Buffered(1)),
                pl.BlockSpec((1, cout_p), lambda i: (0, 0),
                             pipeline_mode=pl.Buffered(1)),
            ],
            out_specs=pl.BlockSpec((rt, cout_p), lambda i: (i, 0)),
            scratch_shapes=[pltpu.VMEM((rt, cout_p), jnp.float32)],
        ),
        compiler_params=pltpu.CompilerParams(
            dimension_semantics=("parallel",),
            vmem_limit_bytes=vmem_limit,
        ),
        cost_estimate=cost,
    )(x2d, w1p, b1p, w2p, b2p)

    if cout_p != cout:
        out = out[:, :cout]
    return out.reshape(orig_shape[:-1] + (cout,))


def _init_params(key, in_features, hidden_features, out_features, dtype=jnp.float32):
    # Deterministic synthetic parameters (PyTorch nn.Linear-like uniform init).
    k1, k2, k3, k4 = jax.random.split(key, 4)
    lim1 = 1.0 / jnp.sqrt(in_features)
    lim2 = 1.0 / jnp.sqrt(hidden_features)
    # Stored as (in, out) so the kernel does x @ W (equivalent to torch x @ W.T).
    w1 = jax.random.uniform(k1, (in_features, hidden_features), dtype, -lim1, lim1)
    b1 = jax.random.uniform(k2, (hidden_features,), dtype, -lim1, lim1)
    w2 = jax.random.uniform(k3, (hidden_features, out_features), dtype, -lim2, lim2)
    b2 = jax.random.uniform(k4, (out_features,), dtype, -lim2, lim2)
    return w1, b1, w2, b2


def _mlp_ref(x, w1, b1, w2, b2):
    # Pure f32 reference of the module's math (fc1 -> exact GELU -> fc2).
    h = x @ w1 + b1
    h = 0.5 * h * (1.0 + lax.erf(h / jnp.sqrt(2.0)))
    return h @ w2 + b2


if __name__ == "__main__":
    key = jax.random.PRNGKey(0)
    kx, kp = jax.random.split(key)

    # Token tensor, channel-last: (B, H, W, C) with C = in_features.
    B, H, W, C = 2, 8, 8, 32
    hidden = 64
    out_features = 32

    x = jax.random.normal(kx, (B, H, W, C), jnp.float32)
    w1, b1, w2, b2 = _init_params(kp, C, hidden, out_features)

    # One-time weight prep (pad/cast hoisted out of the per-call path).
    params, cout = prepare_mlp_params(w1, b1, w2, b2)

    y = mlp_pallas(x, params, out_features=cout)
    y = jax.block_until_ready(y)

    # Sanity check against a pure-JAX f32 reference (loosened tolerance: the kernel
    # uses bf16 MXU operands with f32 accumulation).
    y_ref = _mlp_ref(x.reshape(-1, C), w1, b1, w2, b2).reshape(B, H, W, out_features)
    assert y.shape == (B, H, W, out_features)
    assert jnp.allclose(y, y_ref, atol=2e-2, rtol=2e-2), (
        "mismatch vs reference: max abs err = "
        f"{float(jnp.max(jnp.abs(y - y_ref)))}")

    print("KERNEL_OK")
</pallas_src>

<mosaic_0001>
module attributes {stable_mosaic.version = 11 : i64} {
  func.func @_mlp_kernel(%arg0: i32, %arg1: memref<128x32xf32, #tpu.memory_space<vmem>>, %arg2: memref<32x128xbf16, #tpu.memory_space<vmem>>, %arg3: memref<1x128xf32, #tpu.memory_space<vmem>>, %arg4: memref<128x128xbf16, #tpu.memory_space<vmem>>, %arg5: memref<1x128xf32, #tpu.memory_space<vmem>>, %arg6: memref<128x128xf32, #tpu.memory_space<vmem>>, %arg7: memref<128x128xf32, #tpu.memory_space<vmem>>) attributes {dimension_semantics = [#tpu.dimension_semantics<parallel>], iteration_bounds = array<i64: 1>, scalar_prefetch = 0 : i64, scratch_operands = 1 : i64, tpu.core_type = #tpu.core_type<tc>, window_params = [{transform_indices = @transform_0, window_bounds = array<i64: 128, 32>}, {pipeline_mode = #tpu.pipeline_mode<synchronous>, transform_indices = @transform_1, window_bounds = array<i64: 32, 128>}, {pipeline_mode = #tpu.pipeline_mode<synchronous>, transform_indices = @transform_2, window_bounds = array<i64: 1, 128>}, {pipeline_mode = #tpu.pipeline_mode<synchronous>, transform_indices = @transform_3, window_bounds = array<i64: 128, 128>}, {pipeline_mode = #tpu.pipeline_mode<synchronous>, transform_indices = @transform_4, window_bounds = array<i64: 1, 128>}, {transform_indices = @transform_5, window_bounds = array<i64: 128, 128>}]} {
    %c0 = arith.constant 0 : index
    %c0_0 = arith.constant 0 : index
    %0 = vector.load %arg1[%c0, %c0_0] : memref<128x32xf32, #tpu.memory_space<vmem>>, vector<128x32xf32>
    %1 = arith.truncf %0 : vector<128x32xf32> to vector<128x32xbf16>
    %c0_1 = arith.constant 0 : index
    %c0_2 = arith.constant 0 : index
    %2 = vector.load %arg2[%c0_1, %c0_2] : memref<32x128xbf16, #tpu.memory_space<vmem>>, vector<32x128xbf16>
    %cst = arith.constant dense<0.000000e+00> : vector<128x128xf32>
    %3 = tpu.matmul %1, %2, %cst {dimension_numbers = #tpu.dot_dimension_numbers<[1], [0], [0], [1], [0, 0, 1, 1], [], []>} : vector<128x32xbf16>, vector<32x128xbf16>, vector<128x128xf32> -> vector<128x128xf32>
    %c0_3 = arith.constant 0 : index
    %c0_4 = arith.constant 0 : index
    %4 = vector.load %arg3[%c0_3, %c0_4] : memref<1x128xf32, #tpu.memory_space<vmem>>, vector<1x128xf32>
    %5 = vector.broadcast %4 : vector<1x128xf32> to vector<128x128xf32>
    %6 = arith.addf %3, %5 : vector<128x128xf32>
    %cst_5 = arith.constant 5.000000e-01 : f32
    %7 = vector.broadcast %cst_5 : f32 to vector<128x128xf32>
    %8 = arith.mulf %7, %6 : vector<128x128xf32>
    %cst_6 = arith.constant 0.707106769 : f32
    %9 = vector.broadcast %cst_6 : f32 to vector<128x128xf32>
    %10 = arith.mulf %6, %9 : vector<128x128xf32>
    %11 = math.erf %10 : vector<128x128xf32>
    %cst_7 = arith.constant 1.000000e+00 : f32
    %12 = vector.broadcast %cst_7 : f32 to vector<128x128xf32>
    %13 = arith.addf %12, %11 : vector<128x128xf32>
    %14 = arith.mulf %8, %13 : vector<128x128xf32>
    %15 = arith.truncf %14 : vector<128x128xf32> to vector<128x128xbf16>
    %c0_8 = arith.constant 0 : index
    %c0_9 = arith.constant 0 : index
    %16 = vector.load %arg4[%c0_8, %c0_9] : memref<128x128xbf16, #tpu.memory_space<vmem>>, vector<128x128xbf16>
    %cst_10 = arith.constant dense<0.000000e+00> : vector<128x128xf32>
    %17 = tpu.matmul %15, %16, %cst_10 {dimension_numbers = #tpu.dot_dimension_numbers<[1], [0], [0], [1], [0, 0, 1, 1], [], []>} : vector<128x128xbf16>, vector<128x128xbf16>, vector<128x128xf32> -> vector<128x128xf32>
    %c0_11 = arith.constant 0 : index
    %c0_12 = arith.constant 0 : index
    %18 = vector.load %arg7[%c0_11, %c0_12] : memref<128x128xf32, #tpu.memory_space<vmem>>, vector<128x128xf32>
    tpu.vector_store %arg7[%c0_11, %c0_12], %17 {strides = array<i32>} : memref<128x128xf32, #tpu.memory_space<vmem>>, vector<128x128xf32>,
    %c0_13 = arith.constant 0 : index
    %c0_14 = arith.constant 0 : index
    %19 = vector.load %arg7[%c0_13, %c0_14] : memref<128x128xf32, #tpu.memory_space<vmem>>, vector<128x128xf32>
    %c0_15 = arith.constant 0 : index
    %c0_16 = arith.constant 0 : index
    %20 = vector.load %arg5[%c0_15, %c0_16] : memref<1x128xf32, #tpu.memory_space<vmem>>, vector<1x128xf32>
    %21 = vector.broadcast %20 : vector<1x128xf32> to vector<128x128xf32>
    %22 = arith.addf %19, %21 : vector<128x128xf32>
    %c0_17 = arith.constant 0 : index
    %c0_18 = arith.constant 0 : index
    %23 = vector.load %arg6[%c0_17, %c0_18] : memref<128x128xf32, #tpu.memory_space<vmem>>, vector<128x128xf32>
    tpu.vector_store %arg6[%c0_17, %c0_18], %22 {strides = array<i32>} : memref<128x128xf32, #tpu.memory_space<vmem>>, vector<128x128xf32>,
    return
  }
  func.func @transform_0(%arg0: i32) -> (i32, i32) {
    %c0_i32 = arith.constant 0 : i32
    %c0_i32_0 = arith.constant 0 : i32
    return %arg0, %c0_i32 : i32, i32
  }
  func.func @transform_1(%arg0: i32) -> (i32, i32) {
    %c0_i32 = arith.constant 0 : i32
    %c0_i32_0 = arith.constant 0 : i32
    %c0_i32_1 = arith.constant 0 : i32
    return %c0_i32, %c0_i32_0 : i32, i32
  }
  func.func @transform_2(%arg0: i32) -> (i32, i32) {
    %c0_i32 = arith.constant 0 : i32
    %c0_i32_0 = arith.constant 0 : i32
    %c0_i32_1 = arith.constant 0 : i32
    return %c0_i32, %c0_i32_0 : i32, i32
  }
  func.func @transform_3(%arg0: i32) -> (i32, i32) {
    %c0_i32 = arith.constant 0 : i32
    %c0_i32_0 = arith.constant 0 : i32
    %c0_i32_1 = arith.constant 0 : i32
    return %c0_i32, %c0_i32_0 : i32, i32
  }
  func.func @transform_4(%arg0: i32) -> (i32, i32) {
    %c0_i32 = arith.constant 0 : i32
    %c0_i32_0 = arith.constant 0 : i32
    %c0_i32_1 = arith.constant 0 : i32
    return %c0_i32, %c0_i32_0 : i32, i32
  }
  func.func @transform_5(%arg0: i32) -> (i32, i32) {
    %c0_i32 = arith.constant 0 : i32
    %c0_i32_0 = arith.constant 0 : i32
    return %arg0, %c0_i32 : i32, i32
  }
}

</mosaic_0001>

<bundles_post_ra>
// kernel: tpu_custom_call.1
= control target key start
LH: loop header
LB: loop body
LE: loop exit
PB: predicated region body
PF: predicated region fallthrough
CT: control target
= control target key end

     0   :  { %vm69_vm0 = vcmask 261120   ;;  %s877_s0 = inlined_call_operand.vmem [shape: f32[128,32], index: 0, kind: input, shape index: {}]   ;;  %s878_s1 = inlined_call_operand.vmem [shape: bf16[32,128], index: 1, kind: input, shape index: {}]   ;;  %s879_s2 = inlined_call_operand.vmem [shape: f32[1,128], index: 2, kind: input, shape index: {}]   ;;  %s880_s3 = inlined_call_operand.vmem [shape: bf16[128,128], index: 3, kind: input, shape index: {}]   ;;  %s881_s4 = inlined_call_operand.vmem [shape: f32[1,128], index: 4, kind: input, shape index: {}]   ;;  %s882_s5 = inlined_call_operand.hbm [shape: f32[128,128], index: 5, kind: output, shape index: {}]  }
   0x1   :  { %v644_v0 = vld [vmem:[%s878_s1] sm:$0xff]   ;;  %v645_v1 = vld [vmem:[%s878_s1 + $0x8] sm:$0xff]   ;;  %v24_v5 = vld [vmem:[%s877_s0 + $0x10] sm:$0xff] }
   0x2   :  { %573 = vmatprep.subr.bf16.mxu0 %v644_v0  ;;  %v22_v2 = vld [vmem:[%s877_s0] sm:$0xff]  ;;  %v23_v3 = vld [vmem:[%s877_s0 + $0x8] sm:$0xff]  ;;  %v25_v6 = vld [vmem:[%s877_s0 + $0x18] sm:$0xff] }
   0x3   :  { %574 = vmatpush3.bf16.msra.mxu0 %v644_v0  ;;  %v38_v4 = vpack.c.bf16 %v23_v3, %v22_v2  ;;  %v26_v7 = vld [vmem:[%s877_s0 + $0x20] sm:$0xff]  ;;  %v27_v8 = vld [vmem:[%s877_s0 + $0x28] sm:$0xff]  ;;  %v39_v9 = vpack.c.bf16 %v25_v6, %v24_v5  ;;  %v28_v12 = vld [vmem:[%s877_s0 + $0x30] sm:$0xff] }
   0x4   :  { %575 = vmatprep.subr.bf16.mxu0 %v645_v1  ;;  %v40_v10 = vpack.c.bf16 %v27_v8, %v26_v7  ;;  %v646_v11 = vld [vmem:[%s880_s3] sm:$0xff]   ;;  %v29_v13 = vld [vmem:[%s877_s0 + $0x38] sm:$0xff]  ;;  %v647_v14 = vld [vmem:[%s880_s3 + $0x8] sm:$0xff]  }
   0x5   :  { %577 = vmatprep.mubr.msk.bf16.mxu0 %vm69_vm0, %v38_v4  ;;  %v30_v15 = vld [vmem:[%s877_s0 + $0x40] sm:$0xff]  ;;  %v31_v16 = vld [vmem:[%s877_s0 + $0x48] sm:$0xff]  ;;  %625 = vmatprep.subr.bf16.mxu1 %v646_v11 }
   0x6   :  { %633 = vmatpush3.bf16.msra.mxu1 %v646_v11 }
   0x7   :  { %576 = vmatpush3.bf16.msra.mxu0 %v645_v1 }
   0x8   :  { %593 = vmatprep.subr.bf16.mxu0 %v646_v11 }
   0xa   :  { %578 = vmatmul.mubr.msk.bf16.vlgmr.msra.gmra.mrb[0].mxu0 %vm69_vm0, %v39_v9 }
   0xb   :  { %581 = vmatprep.mubr.msk.bf16.mxu0 %vm69_vm0, %v40_v10  ;;  %594 = vmatpush3.bf16.msra.mxu0 %v646_v11 }
   0xc   :  { %595 = vmatprep.subr.bf16.mxu0 %v647_v14 }
   0xd   :  { %10 = vsyncpa [#allocation4], 0  ;;  %v41_v17 = vpack.c.bf16 %v29_v13, %v28_v12  ;;  %626 = vmatprep.subr.bf16.mxu1 %v647_v14  ;;  %v42_v18 = vpack.c.bf16 %v31_v16, %v30_v15  ;;  %v32_v19 = vld [vmem:[%s877_s0 + $0x50] sm:$0xff]  ;;  %v33_v20 = vld [vmem:[%s877_s0 + $0x58] sm:$0xff] }
   0xe   :  { %634 = vmatpush3.bf16.msra.mxu1 %v647_v14  ;;  %v34_v21 = vld [vmem:[%s877_s0 + $0x60] sm:$0xff]  ;;  %v35_v22 = vld [vmem:[%s877_s0 + $0x68] sm:$0xff]  ;;  %v43_v23 = vpack.c.bf16 %v33_v20, %v32_v19  ;;  %v36_v25 = vld [vmem:[%s877_s0 + $0x70] sm:$0xff] }
   0xf   :  { %596 = vmatpush3.bf16.msra.mxu0 %v647_v14  ;;  %v44_v24 = vpack.c.bf16 %v35_v22, %v34_v21  ;;  %v37_v26 = vld [vmem:[%s877_s0 + $0x78] sm:$0xff]  ;;  %v648_v28 = vld [vmem:[%s880_s3 + $0x10] sm:$0xff]   ;;  %v650_v30 = vld [vmem:[%s880_s3 + $0x20] sm:$0xff]  }
  0x10   :  { %v45_v27 = vpack.c.bf16 %v37_v26, %v36_v25  ;;  %597 = vmatprep.subr.bf16.mxu0 %v648_v28  ;;  %627 = vmatprep.subr.bf16.mxu1 %v648_v28  ;;  %v649_v29 = vld [vmem:[%s880_s3 + $0x18] sm:$0xff]   ;;  %v651_v31 = vld [vmem:[%s880_s3 + $0x28] sm:$0xff]   ;;  %v652_v32 = vld [vmem:[%s880_s3 + $0x30] sm:$0xff]  }
  0x11   :  { %v653_v33 = vld [vmem:[%s880_s3 + $0x38] sm:$0xff]   ;;  %v832_v34 = vld [vmem:[%s879_s2] ss:$0 sm:$0xff] }
  0x12   :  { %582 = vmatmul.mubr.msk.bf16.gmra.mrb[4].mxu0 %vm69_vm0, %v41_v17  ;;  %635 = vmatpush3.bf16.msra.mxu1 %v648_v28 }
  0x13   :  { %585 = vmatprep.mubr.msk.bf16.mxu0 %vm69_vm0, %v42_v18  ;;  %598 = vmatpush3.bf16.msra.mxu0 %v648_v28 }
  0x14   :  { %599 = vmatprep.subr.bf16.mxu0 %v649_v29  ;;  %628 = vmatprep.subr.bf16.mxu1 %v649_v29 }
  0x16   :  { %636 = vmatpush3.bf16.msra.mxu1 %v649_v29 }
  0x17   :  { %600 = vmatpush3.bf16.msra.mxu0 %v649_v29  ;;  %629 = vmatprep.subr.bf16.mxu1 %v650_v30 }
  0x18   :  { %601 = vmatprep.subr.bf16.mxu0 %v650_v30 }
  0x1a   :  { %586 = vmatmul.mubr.msk.bf16.gmra.mrb[8].mxu0 %vm69_vm0, %v43_v23  ;;  %637 = vmatpush3.bf16.msra.mxu1 %v650_v30 }
  0x1b   :  { %589 = vmatprep.mubr.msk.bf16.mxu0 %vm69_vm0, %v44_v24  ;;  %602 = vmatpush3.bf16.msra.mxu0 %v650_v30 }
  0x1c   :  { %603 = vmatprep.subr.bf16.mxu0 %v651_v31  ;;  %630 = vmatprep.subr.bf16.mxu1 %v651_v31 }
  0x1e   :  { %638 = vmatpush3.bf16.msra.mxu1 %v651_v31 }
  0x1f   :  { %604 = vmatpush3.bf16.msra.mxu0 %v651_v31  ;;  %631 = vmatprep.subr.bf16.mxu1 %v652_v32 }
  0x20   :  { %605 = vmatprep.subr.bf16.mxu0 %v652_v32 }
  0x22   :  { %590 = vmatmul.mubr.msk.bf16.gmra.mrb[12].mxu0 %vm69_vm0, %v45_v27  ;;  %639 = vmatpush3.bf16.msra.mxu1 %v652_v32 }
  0x23   :  { %606 = vmatpush3.bf16.msra.mxu0 %v652_v32  ;;  %632 = vmatprep.subr.bf16.mxu1 %v653_v33 }
  0x24   :  { %607 = vmatprep.subr.bf16.mxu0 %v653_v33 }
  0x26   :  { %640 = vmatpush3.bf16.msra.mxu1 %v653_v33 }
  0x27   :  { %608 = vmatpush3.bf16.msra.mxu0 %v653_v33 }
  0xdd   :  { %v579_v35 = vpop.f32.mrb[0].mxu0 }
  0xde   :  { %v137_v36 = vadd.f32 %v579_v35, %v832_v34  ;;  %v128_v37 = vpop.f32.mrb[1].mxu0 }
  0xdf   :  { %v129_v38 = vadd.f32 %v832_v34, %v128_v37  ;;  %v580_v39 = vpop.f32.mrb[2].mxu0 }
  0xe0   :  { %v209_v40 = vmul.f32 0.70710677, %v137_v36  ;;  %v140_v41 = vadd.f32 %v580_v39, %v832_v34  ;;  %v131_v42 = vpop.f32.mrb[3].mxu0  ;;  %v193_v4 = vmul.f32 0.5, %v137_v36 }
  0xe1   :  { %v207_v43 = vmul.f32 0.70710677, %v129_v38  ;;  %v132_v44 = vadd.f32 %v832_v34, %v131_v42  ;;  %v191_v9 = vmul.f32 0.5, %v129_v38 }
  0xe2   :  { %654 = verf.f32 %v209_v40  ;;  %v210_v45 = vmul.f32 0.70710677, %v140_v41  ;;  %v194_v5 = vmul.f32 0.5, %v140_v41 }
  0xe3   :  { %656 = verf.f32 %v207_v43  ;;  %v208_v46 = vmul.f32 0.70710677, %v132_v44  ;;  %v192_v10 = vmul.f32 0.5, %v132_v44 }
  0xe4   :  { %658 = verf.f32 %v210_v45 }
  0xe5   :  { %660 = verf.f32 %v208_v46  ;;  %v583_v47 = vpop.f32.mrb[4].mxu0 }
  0xe6   :  { %v153_v48 = vadd.f32 %v583_v47, %v832_v34  ;;  %v144_v49 = vpop.f32.mrb[5].mxu0 }
  0xe7   :  { %v145_v50 = vadd.f32 %v832_v34, %v144_v49  ;;  %v584_v51 = vpop.f32.mrb[6].mxu0 }
  0xe8   :  { %v213_v52 = vmul.f32 0.70710677, %v153_v48  ;;  %v156_v53 = vadd.f32 %v584_v51, %v832_v34  ;;  %v147_v54 = vpop.f32.mrb[7].mxu0  ;;  %v197_v29 = vmul.f32 0.5, %v153_v48 }
  0xe9   :  { %v211_v55 = vmul.f32 0.70710677, %v145_v50  ;;  %v842_v56 = vadd.f32 %v832_v34, %v147_v54  ;;  %v195_v40 = vmul.f32 0.5, %v145_v50 }
  0xea   :  { %662 = verf.f32 %v213_v52  ;;  %v214_v57 = vmul.f32 0.70710677, %v156_v53  ;;  %v198_v35 = vmul.f32 0.5, %v156_v53 }
  0xeb   :  { %664 = verf.f32 %v211_v55  ;;  %v212_v58 = vmul.f32 0.70710677, %v842_v56  ;;  %v196_v46 = vmul.f32 0.5, %v842_v56 }
  0xec   :  { %v655_v59 = vpop.eup %654  ;;  %666 = verf.f32 %v214_v57 }
  0xed   :  { %v657_v60 = vpop.eup %656  ;;  %v241_v61 = vadd.f32 1.0, %v655_v59  ;;  %668 = verf.f32 %v212_v58  ;;  %v587_v62 = vpop.f32.mrb[8].mxu0 }
  0xee   :  { %v659_v63 = vpop.eup %658  ;;  %v239_v0 = vadd.f32 1.0, %v657_v60  ;;  %v846_v1 = vadd.f32 %v587_v62, %v832_v34  ;;  %v160_v2 = vpop.f32.mrb[9].mxu0 }
  0xef   :  { %v661_v3 = vpop.eup %660  ;;  %v242_v6 = vadd.f32 1.0, %v659_v63  ;;  %v849_v7 = vadd.f32 %v832_v34, %v160_v2  ;;  %v588_v8 = vpop.f32.mrb[10].mxu0  ;;  %v257_v14 = vmul.f32 %v241_v61, %v193_v4 }
  0xf0   :  { %v240_v11 = vadd.f32 1.0, %v661_v3  ;;  %v217_v12 = vmul.f32 0.70710677, %v846_v1  ;;  %v163_v13 = vpop.f32.mrb[11].mxu0  ;;  %v172_v17 = vadd.f32 %v588_v8, %v832_v34  ;;  %v255_v18 = vmul.f32 %v239_v0, %v191_v9 }
  0xf1   :  { %v258_v15 = vmul.f32 %v242_v6, %v194_v5  ;;  %v215_v16 = vmul.f32 0.70710677, %v849_v7  ;;  %v164_v20 = vadd.f32 %v832_v34, %v163_v13  ;;  %v199_v0 = vmul.f32 0.5, %v849_v7 }
  0xf2   :  { %v256_v19 = vmul.f32 %v240_v11, %v192_v10  ;;  %670 = verf.f32 %v217_v12  ;;  %v218_v22 = vmul.f32 0.70710677, %v172_v17  ;;  %v202_v62 = vmul.f32 0.5, %v172_v17 }
  0xf3   :  { %v272_v21 = vpack.c.bf16 %v258_v15, %v257_v14  ;;  %672 = verf.f32 %v215_v16  ;;  %v216_v24 = vmul.f32 0.70710677, %v164_v20  ;;  %v200_v2 = vmul.f32 0.5, %v164_v20 }
  0xf4   :  { %v663_v23 = vpop.eup %662  ;;  %v271_v25 = vpack.c.bf16 %v256_v19, %v255_v18  ;;  %674 = verf.f32 %v218_v22 }
  0xf5   :  { %v665_v26 = vpop.eup %664  ;;  %v591_v27 = vpop.f32.mrb[12].mxu0  ;;  %v245_v30 = vadd.f32 1.0, %v663_v23  ;;  %676 = verf.f32 %v216_v24 }
  0xf6   :  { %v667_v28 = vpop.eup %666  ;;  %v185_v31 = vadd.f32 %v591_v27, %v832_v34  ;;  %v176_v32 = vpop.f32.mrb[13].mxu0  ;;  %609 = vmatprep.mubr.bf16.mxu0 %v271_v25  ;;  %v243_v39 = vadd.f32 1.0, %v665_v26  ;;  %v546_v27 = vld [vmem:[%s881_s4] ss:$0 sm:$0xff]  ;;  %s710_s4 = smov [#allocation3]  }
  0xf7   :  { %v669_v33 = vpop.eup %668  ;;  %v246_v36 = vadd.f32 1.0, %v667_v28  ;;  %v177_v37 = vadd.f32 %v832_v34, %v176_v32  ;;  %v592_v38 = vpop.f32.mrb[14].mxu0  ;;  %610 = vmatmul.mubr.bf16.vlgmr.msra.gmra.mrb[16].mxu0 %v272_v21  ;;  %v261_v49 = vmul.f32 %v245_v30, %v197_v29  ;;  %s516_s19 = sshll.u32 %s710_s4, 4  ;;  %s517_s19 = int_to_ptr.vmem [resolvable:$true] %s516_s19 }
  0xf8   :  { %v221_v41 = vmul.f32 0.70710677, %v185_v31  ;;  %v188_v42 = vadd.f32 %v592_v38, %v832_v34  ;;  %v179_v43 = vpop.f32.mrb[15].mxu0  ;;  %v244_v44 = vadd.f32 1.0, %v669_v33  ;;  %v259_v53 = vmul.f32 %v243_v39, %v195_v40  ;;  %s686_s20 = scalar_lea.vmem %s517_s19, 2048  ;;  %p691_p1 = scmp.lt.s32.totalorder %s517_s19, %s517_s19 }
  0xf9   :  { %v262_v45 = vmul.f32 %v246_v36, %v198_v35  ;;  %v219_v47 = vmul.f32 0.70710677, %v177_v37  ;;  %v180_v48 = vadd.f32 %v832_v34, %v179_v43  ;;  %v201_v34 = vmul.f32 0.5, %v846_v1  ;;  %p687_p0 = scmp.ne.s32.totalorder %s517_s19, %s686_s20  ;;  %p692_p2 = scmp.lt.s32.totalorder %s686_s20, %s686_s20 }
  0xfa   :  { %678 = verf.f32 %v221_v41  ;;  %v222_v51 = vmul.f32 0.70710677, %v188_v42  ;;  %v260_v54 = vmul.f32 %v244_v44, %v196_v46  ;;  %v205_v1 = vmul.f32 0.5, %v185_v31 }
  0xfb   :  { %680 = verf.f32 %v219_v47  ;;  %v220_v52 = vmul.f32 0.70710677, %v180_v48  ;;  %v274_v50 = vpack.c.bf16 %v262_v45, %v261_v49  ;;  %v206_v17 = vmul.f32 0.5, %v188_v42  ;;  %p693_p3 = por %p692_p2, %p691_p1 }
  0xfc   :  { %v671_v55 = vpop.eup %670  ;;  %682 = verf.f32 %v222_v51  ;;  %v273_v58 = vpack.c.bf16 %v260_v54, %v259_v53  ;;  %v203_v19 = vmul.f32 0.5, %v177_v37  ;;  %v204_v7 = vmul.f32 0.5, %v180_v48 }
  0xfd   :  { %v673_v57 = vpop.eup %672  ;;  %684 = verf.f32 %v220_v52  ;;  %v249_v59 = vadd.f32 1.0, %v671_v55  ;;  %p694_p4 = pnand %p693_p3, %p687_p0 }
  0xfe   :  { %v675_v60 = vpop.eup %674  ;;  %v247_v61 = vadd.f32 1.0, %v673_v57  ;;  %613 = vmatprep.mubr.bf16.mxu1 %v273_v58 }
  0xff   :  { %v677_v56 = vpop.eup %676  ;;  %v250_v63 = vadd.f32 1.0, %v675_v60  ;;  %614 = vmatmul.mubr.bf16.vlgmr.msra.gmra.mrb[0].mxu1 %v274_v50  ;;  %v265_v4 = vmul.f32 %v249_v59, %v201_v34 }
 0x100   :  { %v248_v3 = vadd.f32 1.0, %v677_v56  ;;  %v263_v6 = vmul.f32 %v247_v61, %v199_v0 }
 0x101   :  { %v266_v5 = vmul.f32 %v250_v63, %v202_v62 }
 0x102   :  { %v264_v8 = vmul.f32 %v248_v3, %v200_v2 }
 0x103   :  { %v276_v10 = vpack.c.bf16 %v266_v5, %v265_v4 }
 0x104   :  { %v679_v9 = vpop.eup %678  ;;  %v275_v13 = vpack.c.bf16 %v264_v8, %v263_v6 }
 0x105   :  { %v681_v11 = vpop.eup %680  ;;  %v253_v12 = vadd.f32 1.0, %v679_v9 }
 0x106   :  { %v683_v14 = vpop.eup %682  ;;  %v251_v15 = vadd.f32 1.0, %v681_v11  ;;  %617 = vmatprep.mubr.bf16.mxu1 %v275_v13 }
 0x107   :  { %v685_v16 = vpop.eup %684  ;;  %v254_v18 = vadd.f32 1.0, %v683_v14  ;;  %618 = vmatmul.mubr.bf16.gmra.mrb[4].mxu1 %v276_v10  ;;  %v269_v21 = vmul.f32 %v253_v12, %v205_v1 }
 0x108   :  { %v252_v20 = vadd.f32 1.0, %v685_v16  ;;  %v267_v23 = vmul.f32 %v251_v15, %v203_v19 }
 0x109   :  { %v270_v22 = vmul.f32 %v254_v18, %v206_v17 }
 0x10a   :  { %v268_v24 = vmul.f32 %v252_v20, %v204_v7 }
 0x10b   :  { %v278_v25 = vpack.c.bf16 %v270_v22, %v269_v21 }
 0x10c   :  { %v277_v26 = vpack.c.bf16 %v268_v24, %v267_v23 }
 0x10e   :  { %621 = vmatprep.mubr.bf16.mxu1 %v277_v26 }
 0x10f   :  { %622 = vmatmul.mubr.bf16.gmra.mrb[8].mxu1 %v278_v25 }
 0x1ca   :  { %v611_v28 = vpop.f32.mrb[16].mxu0 }
 0x1cb   :  { %v481_v29 = vadd.f32 %v611_v28, %v546_v27  ;;  %v377_v30 = vpop.f32.mrb[17].mxu0 }
 0x1cc   :  { %v479_v31 = vadd.f32 %v546_v27, %v377_v30  ;;  %v612_v32 = vpop.f32.mrb[18].mxu0 }
 0x1cd   :  { %497 = vst [vmem:[#allocation3 + $0x10] sm:$0xff] %v481_v29  ;;  %v482_v33 = vadd.f32 %v612_v32, %v546_v27  ;;  %v380_v35 = vpop.f32.mrb[19].mxu0 }
 0x1ce   :  { %495 = vst [vmem:[#allocation3] sm:$0xff] %v479_v31  ;;  %v480_v36 = vadd.f32 %v546_v27, %v380_v35 }
 0x1cf   :  { %498 = vst [vmem:[#allocation3 + $0x18] sm:$0xff] %v482_v33 }
 0x1d0   :  { %496 = vst [vmem:[#allocation3 + $0x8] sm:$0xff] %v480_v36 }
 0x1d2   :  { %v615_v37 = vpop.f32.mrb[0].mxu1 }
 0x1d3   :  { %v485_v38 = vadd.f32 %v615_v37, %v546_v27  ;;  %v393_v39 = vpop.f32.mrb[1].mxu1 }
 0x1d4   :  { %v483_v40 = vadd.f32 %v546_v27, %v393_v39  ;;  %v616_v41 = vpop.f32.mrb[2].mxu1 }
 0x1d5   :  { %501 = vst [vmem:[#allocation3 + $0x30] sm:$0xff] %v485_v38  ;;  %v486_v42 = vadd.f32 %v616_v41, %v546_v27  ;;  %v396_v43 = vpop.f32.mrb[3].mxu1 }
 0x1d6   :  { %499 = vst [vmem:[#allocation3 + $0x20] sm:$0xff] %v483_v40  ;;  %v484_v44 = vadd.f32 %v546_v27, %v396_v43 }
 0x1d7   :  { %502 = vst [vmem:[#allocation3 + $0x38] sm:$0xff] %v486_v42 }
 0x1d8   :  { %500 = vst [vmem:[#allocation3 + $0x28] sm:$0xff] %v484_v44 }
 0x1da   :  { %v619_v45 = vpop.f32.mrb[4].mxu1 }
 0x1db   :  { %v489_v46 = vadd.f32 %v619_v45, %v546_v27  ;;  %v409_v47 = vpop.f32.mrb[5].mxu1 }
 0x1dc   :  { %v487_v48 = vadd.f32 %v546_v27, %v409_v47  ;;  %v620_v49 = vpop.f32.mrb[6].mxu1 }
 0x1dd   :  { %505 = vst [vmem:[#allocation3 + $0x50] sm:$0xff] %v489_v46  ;;  %v490_v51 = vadd.f32 %v620_v49, %v546_v27  ;;  %v412_v52 = vpop.f32.mrb[7].mxu1 }
 0x1de   :  { %503 = vst [vmem:[#allocation3 + $0x40] sm:$0xff] %v487_v48  ;;  %v488_v53 = vadd.f32 %v546_v27, %v412_v52 }
 0x1df   :  { %506 = vst [vmem:[#allocation3 + $0x58] sm:$0xff] %v490_v51 }
 0x1e0   :  { %504 = vst [vmem:[#allocation3 + $0x48] sm:$0xff] %v488_v53 }
 0x1e2   :  { %v623_v54 = vpop.f32.mrb[8].mxu1 }
 0x1e3   :  { %v493_v55 = vadd.f32 %v623_v54, %v546_v27  ;;  %v425_v50 = vpop.f32.mrb[9].mxu1 }
 0x1e4   :  { %v491_v57 = vadd.f32 %v546_v27, %v425_v50  ;;  %v624_v58 = vpop.f32.mrb[10].mxu1 }
 0x1e5   :  { %509 = vst [vmem:[#allocation3 + $0x70] sm:$0xff] %v493_v55  ;;  %v494_v59 = vadd.f32 %v624_v58, %v546_v27  ;;  %v428_v60 = vpop.f32.mrb[11].mxu1 }
 0x1e6   :  { %507 = vst [vmem:[#allocation3 + $0x60] sm:$0xff] %v491_v57  ;;  %v492_v61 = vadd.f32 %v546_v27, %v428_v60 }
 0x1e7   :  { %510 = vst [vmem:[#allocation3 + $0x78] sm:$0xff] %v494_v59 }
 0x1e8   :  { %508 = vst [vmem:[#allocation3 + $0x68] sm:$0xff] %v492_v61 }
 0x1e9   :  { %697 = shalt.err (!%p694_p4)
}
 0x1ea   :  { %s698_s23 = scalar_lea.hbm %s882_s5, 2048 }
 0x1eb   :  { %p699_p5 = scmp.ne.s32.totalorder %s882_s5, %s698_s23  ;;  %p702_p6 = scmp.lt.u32.totalorder %s698_s23, %s882_s5 }
 0x1ed   :  { %p704_p7 = pnand %p702_p6, %p699_p5 }
 0x1ef   :  { %707 = shalt.err (!%p704_p7)
}
 0x1f0   :  { %s711_s28 = smov 128   ;;  %s712_s29 = smov 8  }
 0x1f1   :  { %522 = dma.vmem_to_hbm [thread:$0]  %s517_s19, 2048, %s882_s5, [#allocation4], %s711_s28, %s711_s28, %s712_s29  }
 0x1f2   :  { %708 = dma.done.wait [#allocation4], 2048  }
 0x1f3   :  { %709 = vsyncadd [#allocation4], 4294965248 }
 0x1f4   :  { %526 = vsyncpa [#allocation4], 1 }

</bundles_post_ra>
